<compile_context>
chip_gen: v5e
topology: v5e:2x2
jax: 0.10.0
libtpu: 0.0.40
codegen_flags: <defaults>
</compile_context>

<pallas_src>
import jax
import jax.numpy as jnp
from jax import lax
from jax.experimental import pallas as pl
from jax.experimental.pallas import tpu as pltpu


# ----------------------------------------------------------------------------
# tiling helpers
# ----------------------------------------------------------------------------

def _pick_tile(length, target):
    """Largest tile <= target that divides `length` and is a multiple of 8,
    falling back to the full extent (always a legal block)."""
    if length <= target:
        return length
    t = (target // 8) * 8
    while t >= 8:
        if length % t == 0:
            return t
        t -= 8
    return length


def _tpu_vmem_bytes():
    try:
        return int(pltpu.get_tpu_info().vmem_capacity_bytes)
    except Exception:
        return None


def _tiling_defaults():
    """(q_tile_target, kv_tile_target, vmem_limit_bytes) per TPU generation."""
    cap = _tpu_vmem_bytes()
    if cap is not None and cap >= (100 << 20):      # v5e / v6e: 128 MiB VMEM
        return 256, 512, 96 << 20
    if cap is not None:                              # v7x: 64 MiB VMEM
        return 128, 512, 40 << 20
    return 128, 512, None                            # unknown: be conservative


def _compiler_params(dim_sems, vmem_limit):
    kwargs = dict(dimension_semantics=dim_sems)
    if vmem_limit is not None:
        kwargs["vmem_limit_bytes"] = vmem_limit
    return pltpu.CompilerParams(**kwargs)


# ----------------------------------------------------------------------------
# kernels
# ----------------------------------------------------------------------------

def _make_attn_kernel(scale, e, has_mask):
    """Per-(batch*head, q-tile) kernel that also emits the attention matrix."""

    def kernel(*refs):
        if has_mask:
            q_ref, k_ref, v_ref, m_ref, o_ref, a_ref = refs
        else:
            q_ref, k_ref, v_ref, o_ref, a_ref = refs

        q = q_ref[0] * scale                       # fold 1/sqrt(D) into q  (tq, D)
        k = k_ref[0]                               # (Lk, D) stays in input dtype
        v = v_ref[0]                               # (Lk, D)

        # q @ k^T as a transposed contraction (MXU handles it; no XLU transpose)
        s = lax.dot_general(q, k, (((1,), (1,)), ((), ())),
                            preferred_element_type=jnp.float32)   # (tq, Lk) f32
        if has_mask:
            s = jnp.where(m_ref[0, 0] == 0, jnp.float32(e), s)

        m = jnp.max(s, axis=-1, keepdims=True)
        p = jnp.exp(s - m)
        inv_l = pl.reciprocal(jnp.sum(p, axis=-1, keepdims=True))
        attn = p * inv_l                                          # (tq, Lk) f32

        out = jnp.dot(attn.astype(v.dtype), v,
                      preferred_element_type=jnp.float32)         # (tq, D)

        o_ref[0] = out.astype(o_ref.dtype)
        a_ref[0] = attn.astype(a_ref.dtype)

    return kernel


def _make_flash_kernel(scale, e, has_mask):
    """Flash-attention (online softmax) kernel; grid (N, q-tiles, kv-tiles)."""

    def kernel(*refs):
        if has_mask:
            q_ref, k_ref, v_ref, m_ref, o_ref, m_sc, l_sc, acc_sc = refs
        else:
            q_ref, k_ref, v_ref, o_ref, m_sc, l_sc, acc_sc = refs

        kv = pl.program_id(2)

        @pl.when(kv == 0)
        def _():
            m_sc[...] = jnp.full_like(m_sc[...], -jnp.inf)
            l_sc[...] = jnp.zeros_like(l_sc[...])
            acc_sc[...] = jnp.zeros_like(acc_sc[...])

        q = q_ref[0] * scale                                       # (tq, D)
        s = lax.dot_general(q, k_ref[0], (((1,), (1,)), ((), ())),
                            preferred_element_type=jnp.float32)    # (tq, tk) f32
        if has_mask:
            s = jnp.where(m_ref[0, 0] == 0, jnp.float32(e), s)

        m_prev = m_sc[...]
        m_new = jnp.maximum(m_prev, jnp.max(s, axis=-1, keepdims=True))
        alpha = jnp.exp(m_prev - m_new)
        p = jnp.exp(s - m_new)
        l_sc[...] = alpha * l_sc[...] + jnp.sum(p, axis=-1, keepdims=True)
        acc_sc[...] = alpha * acc_sc[...] + jnp.dot(
            p.astype(v_ref.dtype), v_ref[0], preferred_element_type=jnp.float32)
        m_sc[...] = m_new

        @pl.when(kv == pl.num_programs(2) - 1)
        def _():
            o_ref[0] = (acc_sc[...] * pl.reciprocal(l_sc[...])).astype(o_ref.dtype)

    return kernel


# ----------------------------------------------------------------------------
# wrappers
# ----------------------------------------------------------------------------

def _sdpa_4d(q, k, v, mask, e, return_attention, block_q, block_kv):
    b, h, lq, d = q.shape
    lk = k.shape[2]
    n = b * h
    scale = float(d) ** (-0.5)

    tq_target, tk_target, vmem_limit = _tiling_defaults()
    if block_q is not None:
        tq_target = block_q
    if block_kv is not None:
        tk_target = block_kv
    tq = _pick_tile(lq, tq_target)
    nq = lq // tq

    qf = q.reshape(n, lq, d)
    kf = k.reshape(n, lk, d)
    vf = v.reshape(n, lk, d)

    has_mask = mask is not None
    if has_mask:
        m4 = jnp.asarray(mask)
        while m4.ndim < 4:
            m4 = m4[None]
        mb, mh = int(m4.shape[0]), int(m4.shape[1])
        # Broadcast only the (Lq, Lk) dims; batch/head broadcast is resolved in
        # the index_map so the mask is never replicated B*H times in HBM.
        m4 = jnp.broadcast_to(m4, (mb, mh, lq, lk)).astype(jnp.int32)
        # TODO(synk): an int8 / precomputed additive-bias mask would cut the
        # mask DMA a further 4x.

    if return_attention:
        def q_map(i, qi):
            return (i, qi, 0)

        def kv_map(i, qi):
            return (i, 0, 0)

        def a_map(i, qi):
            return (i, qi, 0)

        in_specs = [pl.BlockSpec((1, tq, d), q_map),
                    pl.BlockSpec((1, lk, d), kv_map),
                    pl.BlockSpec((1, lk, d), kv_map)]
        args = [qf, kf, vf]
        if has_mask:
            def mask_map(i, qi):
                bi = (i // h) if mb == b else 0
                hi = (i % h) if mh == h else 0
                return (bi, hi, qi, 0)
            in_specs.append(pl.BlockSpec((1, 1, tq, lk), mask_map))
            args.append(m4)

        out, attn = pl.pallas_call(
            _make_attn_kernel(scale, e, has_mask),
            out_shape=(jax.ShapeDtypeStruct((n, lq, d), q.dtype),
                       jax.ShapeDtypeStruct((n, lq, lk), q.dtype)),
            grid=(n, nq),
            in_specs=in_specs,
            out_specs=(pl.BlockSpec((1, tq, d), q_map),
                       pl.BlockSpec((1, tq, lk), a_map)),
            compiler_params=_compiler_params(("parallel", "parallel"),
                                             vmem_limit),
        )(*args)
        return out.reshape(b, h, lq, d), attn.reshape(b, h, lq, lk)

    # flash path (no attention matrix writeback): tile Lk too, online softmax
    tk = _pick_tile(lk, tk_target)
    nkv = lk // tk

    def q_map(i, qi, ki):
        return (i, qi, 0)

    def k_map(i, qi, ki):
        return (i, ki, 0)

    def o_map(i, qi, ki):
        return (i, qi, 0)

    in_specs = [pl.BlockSpec((1, tq, d), q_map),
                pl.BlockSpec((1, tk, d), k_map),
                pl.BlockSpec((1, tk, d), k_map)]
    args = [qf, kf, vf]
    if has_mask:
        def mask_map(i, qi, ki):
            bi = (i // h) if mb == b else 0
            hi = (i % h) if mh == h else 0
            return (bi, hi, qi, ki)
        in_specs.append(pl.BlockSpec((1, 1, tq, tk), mask_map))
        args.append(m4)

    out = pl.pallas_call(
        _make_flash_kernel(scale, e, has_mask),
        out_shape=jax.ShapeDtypeStruct((n, lq, d), q.dtype),
        grid=(n, nq, nkv),
        in_specs=in_specs,
        out_specs=pl.BlockSpec((1, tq, d), o_map),
        scratch_shapes=[pltpu.VMEM((tq, 1), jnp.float32),
                        pltpu.VMEM((tq, 1), jnp.float32),
                        pltpu.VMEM((tq, d), jnp.float32)],
        compiler_params=_compiler_params(
            ("parallel", "parallel", "arbitrary"), vmem_limit),
    )(*args)
    return out.reshape(b, h, lq, d), None


def scale_dot_product_attention(q, k, v, mask=None, e=1e-12,
                                return_attention=True,
                                block_q=None, block_kv=None):
    """Mirrors ScaleDotProductAttention.forward (dropout=0 => identity).

    return_attention=True reproduces the module's (output, attention) return;
    return_attention=False uses the fused flash-attention path and returns
    (output, None).
    """
    if q.ndim == 4:
        return _sdpa_4d(q, k, v, mask, e, return_attention, block_q, block_kv)

    # 3-D path (B, L, D): treat as a single head.
    m = mask
    if m is not None:
        m = jnp.asarray(m)
        while m.ndim < 3:
            m = m[None]
        m = m[:, None]                      # insert head dim
    out, attn = _sdpa_4d(q[:, None], k[:, None], v[:, None], m, e,
                         return_attention, block_q, block_kv)
    out = out[:, 0]
    attn = attn[:, 0] if attn is not None else None
    return out, attn


# ----------------------------------------------------------------------------
# reference + self-test
# ----------------------------------------------------------------------------

def _reference(q, k, v, mask=None, e=1e-12):
    d = q.shape[-1]
    qf, kf, vf = (x.astype(jnp.float32) for x in (q, k, v))
    s = jnp.einsum('bhid,bhjd->bhij', qf, kf) * d ** (-0.5)
    if mask is not None:
        s = jnp.where(mask == 0, e, s)
    a = jax.nn.softmax(s, axis=-1)
    o = jnp.einsum('bhij,bhjd->bhid', a, vf)
    return o, a


if __name__ == "__main__":
    key = jax.random.PRNGKey(0)
    kq, kk, kv_, km = jax.random.split(key, 4)

    # --- small shapes consistent with the module: batch=2, head=2, seq=8, dim=32
    b, h, s, d = 2, 2, 8, 32
    q = jax.random.normal(kq, (b, h, s, d), dtype=jnp.float32)
    k = jax.random.normal(kk, (b, h, s, d), dtype=jnp.float32)
    v = jax.random.normal(kv_, (b, h, s, d), dtype=jnp.float32)
    mask = (jax.random.uniform(km, (b, 1, s, s)) > 0.3).astype(jnp.int32)

    out, attn = scale_dot_product_attention(q, k, v)
    jax.block_until_ready((out, attn))
    ref_o, ref_a = _reference(q, k, v)
    assert jnp.allclose(out, ref_o, atol=1e-5, rtol=1e-5)
    assert jnp.allclose(attn, ref_a, atol=1e-5, rtol=1e-5)

    out_m, attn_m = scale_dot_product_attention(q, k, v, mask=mask)
    jax.block_until_ready((out_m, attn_m))
    ref_om, ref_am = _reference(q, k, v, mask=mask)
    assert jnp.allclose(out_m, ref_om, atol=1e-5, rtol=1e-5)
    assert jnp.allclose(attn_m, ref_am, atol=1e-5, rtol=1e-5)

    # --- larger bf16 case exercising q/kv tiling, the compact-mask path and
    #     the flash (no attention writeback) path
    b2, h2, s2, d2 = 1, 2, 256, 128
    q2 = jax.random.normal(kq, (b2, h2, s2, d2), dtype=jnp.bfloat16)
    k2 = jax.random.normal(kk, (b2, h2, s2, d2), dtype=jnp.bfloat16)
    v2 = jax.random.normal(kv_, (b2, h2, s2, d2), dtype=jnp.bfloat16)
    mask2 = (jax.random.uniform(km, (1, 1, s2, s2)) > 0.1).astype(jnp.int32)
    ref_o2, ref_a2 = _reference(q2, k2, v2, mask=mask2)

    out2, _ = scale_dot_product_attention(q2, k2, v2, mask=mask2,
                                          return_attention=False,
                                          block_q=128, block_kv=128)
    jax.block_until_ready(out2)
    assert jnp.allclose(out2.astype(jnp.float32), ref_o2, atol=3e-2, rtol=3e-2)

    out3, attn3 = scale_dot_product_attention(q2, k2, v2, mask=mask2,
                                              block_q=128)
    jax.block_until_ready((out3, attn3))
    assert jnp.allclose(out3.astype(jnp.float32), ref_o2, atol=3e-2, rtol=3e-2)
    assert jnp.allclose(attn3.astype(jnp.float32), ref_a2, atol=3e-2, rtol=3e-2)

    print("KERNEL_OK")
</pallas_src>

<mosaic_0001>
module attributes {stable_mosaic.version = 11 : i64} {
  func.func @kernel(%arg0: i32, %arg1: i32, %arg2: memref<1x8x32xf32, #tpu.memory_space<vmem>>, %arg3: memref<1x8x32xf32, #tpu.memory_space<vmem>>, %arg4: memref<1x8x32xf32, #tpu.memory_space<vmem>>, %arg5: memref<1x8x32xf32, #tpu.memory_space<vmem>>, %arg6: memref<1x8x8xf32, #tpu.memory_space<vmem>>) attributes {dimension_semantics = [#tpu.dimension_semantics<parallel>, #tpu.dimension_semantics<parallel>], iteration_bounds = array<i64: 4, 1>, scalar_prefetch = 0 : i64, scratch_operands = 0 : i64, tpu.core_type = #tpu.core_type<tc>, window_params = [{transform_indices = @transform_0, window_bounds = array<i64: 1, 8, 32>}, {transform_indices = @transform_1, window_bounds = array<i64: 1, 8, 32>}, {transform_indices = @transform_2, window_bounds = array<i64: 1, 8, 32>}, {transform_indices = @transform_3, window_bounds = array<i64: 1, 8, 32>}, {transform_indices = @transform_4, window_bounds = array<i64: 1, 8, 8>}]} {
    %c0 = arith.constant 0 : index
    %c0_0 = arith.constant 0 : index
    %c0_1 = arith.constant 0 : index
    %0 = vector.load %arg2[%c0, %c0_0, %c0_1] : memref<1x8x32xf32, #tpu.memory_space<vmem>>, vector<1x8x32xf32>
    %1 = vector.shape_cast %0 : vector<1x8x32xf32> to vector<8x32xf32>
    %cst = arith.constant 0.176776692 : f32
    %2 = vector.broadcast %cst : f32 to vector<8x32xf32>
    %3 = arith.mulf %1, %2 : vector<8x32xf32>
    %c0_2 = arith.constant 0 : index
    %c0_3 = arith.constant 0 : index
    %c0_4 = arith.constant 0 : index
    %4 = vector.load %arg3[%c0_2, %c0_3, %c0_4] : memref<1x8x32xf32, #tpu.memory_space<vmem>>, vector<1x8x32xf32>
    %5 = vector.shape_cast %4 : vector<1x8x32xf32> to vector<8x32xf32>
    %c0_5 = arith.constant 0 : index
    %c0_6 = arith.constant 0 : index
    %c0_7 = arith.constant 0 : index
    %6 = vector.load %arg4[%c0_5, %c0_6, %c0_7] : memref<1x8x32xf32, #tpu.memory_space<vmem>>, vector<1x8x32xf32>
    %7 = vector.shape_cast %6 : vector<1x8x32xf32> to vector<8x32xf32>
    %cst_8 = arith.constant dense<0.000000e+00> : vector<8x8xf32>
    %8 = tpu.matmul %3, %5, %cst_8 {dimension_numbers = #tpu.dot_dimension_numbers<[1], [1], [0], [0], [0, 0, 1, 0], [], []>} : vector<8x32xf32>, vector<8x32xf32>, vector<8x8xf32> -> vector<8x8xf32>
    %cst_9 = arith.constant dense<0xFF800000> : vector<8xf32>
    %9 = vector.multi_reduction <maximumf>, %8, %cst_9 [1] : vector<8x8xf32> to vector<8xf32>
    %10 = vector.shape_cast %9 : vector<8xf32> to vector<8x1xf32>
    %11 = vector.broadcast %10 : vector<8x1xf32> to vector<8x8xf32>
    %12 = arith.subf %8, %11 : vector<8x8xf32>
    %13 = math.exp %12 : vector<8x8xf32>
    %cst_10 = arith.constant dense<0.000000e+00> : vector<8xf32>
    %14 = vector.multi_reduction <add>, %13, %cst_10 [1] : vector<8x8xf32> to vector<8xf32>
    %15 = vector.shape_cast %14 : vector<8xf32> to vector<8x1xf32>
    %16 = tpu.reciprocal %15 : vector<8x1xf32> -> vector<8x1xf32>
    %17 = vector.broadcast %16 : vector<8x1xf32> to vector<8x8xf32>
    %18 = arith.mulf %13, %17 : vector<8x8xf32>
    %cst_11 = arith.constant dense<0.000000e+00> : vector<8x32xf32>
    %19 = tpu.matmul %18, %7, %cst_11 {dimension_numbers = #tpu.dot_dimension_numbers<[1], [0], [0], [1], [0, 0, 1, 1], [], []>} : vector<8x8xf32>, vector<8x32xf32>, vector<8x32xf32> -> vector<8x32xf32>
    %c0_12 = arith.constant 0 : index
    %c0_13 = arith.constant 0 : index
    %c0_14 = arith.constant 0 : index
    %20 = vector.load %arg5[%c0_12, %c0_13, %c0_14] : memref<1x8x32xf32, #tpu.memory_space<vmem>>, vector<1x8x32xf32>
    %21 = vector.shape_cast %20 : vector<1x8x32xf32> to vector<8x32xf32>
    %22 = vector.shape_cast %19 : vector<8x32xf32> to vector<1x8x32xf32>
    tpu.vector_store %arg5[%c0_12, %c0_13, %c0_14], %22 {strides = array<i32>} : memref<1x8x32xf32, #tpu.memory_space<vmem>>, vector<1x8x32xf32>,
    %c0_15 = arith.constant 0 : index
    %c0_16 = arith.constant 0 : index
    %c0_17 = arith.constant 0 : index
    %23 = vector.load %arg6[%c0_15, %c0_16, %c0_17] : memref<1x8x8xf32, #tpu.memory_space<vmem>>, vector<1x8x8xf32>
    %24 = vector.shape_cast %23 : vector<1x8x8xf32> to vector<8x8xf32>
    %25 = vector.shape_cast %18 : vector<8x8xf32> to vector<1x8x8xf32>
    tpu.vector_store %arg6[%c0_15, %c0_16, %c0_17], %25 {strides = array<i32>} : memref<1x8x8xf32, #tpu.memory_space<vmem>>, vector<1x8x8xf32>,
    return
  }
  func.func @transform_0(%arg0: i32, %arg1: i32) -> (i32, i32, i32) {
    %c0_i32 = arith.constant 0 : i32
    %c0_i32_0 = arith.constant 0 : i32
    return %arg0, %arg1, %c0_i32 : i32, i32, i32
  }
  func.func @transform_1(%arg0: i32, %arg1: i32) -> (i32, i32, i32) {
    %c0_i32 = arith.constant 0 : i32
    %c0_i32_0 = arith.constant 0 : i32
    %c0_i32_1 = arith.constant 0 : i32
    return %arg0, %c0_i32, %c0_i32_0 : i32, i32, i32
  }
  func.func @transform_2(%arg0: i32, %arg1: i32) -> (i32, i32, i32) {
    %c0_i32 = arith.constant 0 : i32
    %c0_i32_0 = arith.constant 0 : i32
    %c0_i32_1 = arith.constant 0 : i32
    return %arg0, %c0_i32, %c0_i32_0 : i32, i32, i32
  }
  func.func @transform_3(%arg0: i32, %arg1: i32) -> (i32, i32, i32) {
    %c0_i32 = arith.constant 0 : i32
    %c0_i32_0 = arith.constant 0 : i32
    return %arg0, %arg1, %c0_i32 : i32, i32, i32
  }
  func.func @transform_4(%arg0: i32, %arg1: i32) -> (i32, i32, i32) {
    %c0_i32 = arith.constant 0 : i32
    %c0_i32_0 = arith.constant 0 : i32
    return %arg0, %arg1, %c0_i32 : i32, i32, i32
  }
}

</mosaic_0001>

<bundles_post_ra>
// kernel: tpu_custom_call.1
= control target key start
LH: loop header
LB: loop body
LE: loop exit
PB: predicated region body
PF: predicated region fallthrough
CT: control target
= control target key end

     0   :  { %s1114_s0 = inlined_call_operand.hbm [shape: f32[4,8,32], index: 0, kind: input, shape index: {}]   ;;  %s1115_s1 = inlined_call_operand.hbm [shape: f32[4,8,32], index: 1, kind: input, shape index: {}]   ;;  %s1116_s2 = inlined_call_operand.hbm [shape: f32[4,8,32], index: 2, kind: input, shape index: {}]   ;;  %s1117_s3 = inlined_call_operand.hbm [shape: f32[4,8,32], index: 3, kind: output, shape index: {0}]   ;;  %s1118_s4 = inlined_call_operand.hbm [shape: f32[4,8,8], index: 4, kind: output, shape index: {1}]  }
   0x1   :  { %1122 = sst [smem:[#allocation19_spill]] %s1115_s1 }
   0x2   :  { %10 = vsyncpa [#allocation3], 0 }
   0x3   :  { %12 = vsyncpa [#allocation3 + $0x1], 0 }
   0x4   :  { %13 = vsyncpa [#allocation6], 0 }
   0x5   :  { %15 = vsyncpa [#allocation6 + $0x1], 0 }
   0x6   :  { %16 = vsyncpa [#allocation4], 0 }
   0x7   :  { %18 = vsyncpa [#allocation4 + $0x1], 0 }
   0x8   :  { %19 = vsyncpa [#allocation10], 0 }
   0x9   :  { %21 = vsyncpa [#allocation10 + $0x1], 0  ;;  %s936_s15 = smov 0   ;;  %s938_s16 = smov 0  }
   0xa   :  { %s940_s17 = smov 0   ;;  %s942_s18 = smov 0  }
   0xb   :  { %s944_s19 = smov 0   ;;  %s946_s20 = smov 0  }
   0xc LB: > { %1123 = sst [smem:[#allocation15_spill]] %s897_s17  ;;  %s967_s21 = sadd.s32 4294967295, %s909_s20   ;;  %s909_s20 = sphi %s946_s20, %s27_s20   ;;  %s905_s19 = sphi %s944_s19, %s1137_s19   ;;  %s901_s18 = sphi %s942_s18, %s1136_s18   ;;  %s897_s17 = sphi %s940_s17, %s1135_s17   ;;  %s893_s16 = sphi %s938_s16, %s1139_s16   ;;  %s889_s15 = sphi %s936_s15, %s1138_s15  }
   0xd   : > { %1124 = sst [smem:[#allocation16_spill]] %s905_s19  ;;  %s596_s22 = sadd.s32 4294967294, %s909_s20  }
   0xe   : > { %s39_s23 = sadd.s32 1, %s905_s19  ;;  %s48_s24 = sadd.s32 1, %s897_s17 }
   0xf   : > { %p41_p0 = scmp.ge.s32.totalorder %s39_s23, 4  ;;  %p55_p1 = scmp.ne.s32.totalorder %s897_s17, %s893_s16 }
  0x10   : > { %p56_p2 = scmp.eq.s32.totalorder %s909_s20, 0  ;;  %p61_p3 = scmp.ne.s32.totalorder %s893_s16, %s889_s15 }
  0x11   : > { %s1141_s23 = smov (%p41_p0, %s39_s23), 0  ;;  %p62_p5 = scmp.eq.s32.totalorder %s967_s21, 0 }
  0x12   : > { %1125 = sst [smem:[#allocation17_spill]] %s1141_s23  ;;  %p979_p4 = por %p56_p2, %p55_p1 }
  0x13   : > { %s43_s26 = ssub.s32 %s905_s19, %s1141_s23  ;;  %p139_p6 = scmp.eq.s32.totalorder %s967_s21, 3 }
  0x14   : > { %p46_p7 = scmp.eq.s32.totalorder %s43_s26, 0  ;;  %p987_p8 = por %p62_p5, %p61_p3 }
  0x15   : > { %p991_p9 = por %p139_p6, %p55_p1  ;;  %p145_p10 = scmp.eq.s32.totalorder %s596_s22, 3 }
  0x16   : > { %s996_s29 = scalar_select %p46_p7, %s897_s17, %s48_s24  }
  0x17   : > { %p998_p11 = por %p145_p10, %p61_p3  ;;  %p647_p12 = scmp.lt.s32.totalorder %s909_s20, 4 }
  0x18   : > { %1129 = sst [smem:[#allocation18_spill]] %s996_s29  ;;  %s193_s5 = sand.u32 1, %s897_s17  }
  0x19   : > { %s599_s6 = sshll.u32 %s193_s5, 3  ;;  %s600_s7 = sshll.u32 %s905_s19, 3 }
  0x1a   : > { %p1007_p13 = pnand %p647_p12, %p979_p4  ;;  %s213_s9 = sand.u32 1, %s909_s20  }
  0x1b   : > { %s1132_s1 = sld [smem:[#allocation19_spill]]  ;;  %s217_s14 = scalar_lea.vmem [#allocation5], %s599_s6 }
  0x1c   : > { %s225_s22 = sshll.u32 %s217_s14, 4  ;;  %s214_s24 = scalar_lea.sflag [#allocation6], %s213_s9  ;;  %s226_s22 = int_to_ptr.vmem [resolvable:$true] %s225_s22 }
  0x1d   : > { %p605_p0 = scmp.ge.s32.totalorder %s909_s20, 1  ;;  %p249_p1 = scmp.lt.s32.totalorder %s909_s20, 5 }
  0x1e   : > { %s202_s10 = scalar_lea.hbm %s1114_s0, %s600_s7  ;;  %s194_s14 = scalar_lea.sflag [#allocation3], %s193_s5 }
  0x1f   : > { %p1019_p2 = pnand %p605_p0, %p249_p1  ;;  %s204_s11 = sshll.u32 %s202_s10, 4  ;;  %s205_s11 = int_to_ptr.hbm [resolvable:$true] %s204_s11 }
  0x20   : > { %s236_s29 = scalar_lea.vmem [#allocation7], %s599_s6  ;;  %s1036_s23 = sand.u32 (!%p1019_p2), 1, %s893_s16  }
  0x21   : > { %s221_s12 = scalar_lea.hbm %s1132_s1, %s600_s7  ;;  %s244_s17 = sshll.u32 %s236_s29, 4  ;;  %s245_s17 = int_to_ptr.vmem [resolvable:$true] %s244_s17 }
  0x22   : > { %s223_s13 = sshll.u32 %s221_s12, 4  ;;  %s197_s12 = scalar_lea.vmem [#allocation2], %s599_s6  ;;  %s224_s13 = int_to_ptr.hbm [resolvable:$true] %s223_s13 }
  0x23   : > { %636 = dma.hbm_to_vmem [thread:$0]  (!%p1007_p13), %s224_s13, 128, %s226_s22, %s214_s24  }
  0x24   : > { %s206_s1 = sshll.u32 %s197_s12, 4  ;;  %s240_s22 = scalar_lea.hbm %s1116_s2, %s600_s7  ;;  %s207_s1 = int_to_ptr.vmem [resolvable:$true] %s206_s1 }
  0x25   : > { %633 = dma.hbm_to_vmem [thread:$0]  (!%p1007_p13), %s205_s11, 128, %s207_s1, %s194_s14  }
  0x26   : > { %s242_s19 = sshll.u32 %s240_s22, 4  ;;  %253 = sbr.rel (%p1019_p2) target bundleno = 570 (0x23a), region = 32  ;;  %s243_s19 = int_to_ptr.hbm [resolvable:$true] %s242_s19 }
  0x27   : > { %639 = dma.hbm_to_vmem [thread:$0]  (!%p1007_p13), %s243_s19, 128, %s245_s17, %s214_s24  }
  0x28   : > { %s1039_s1 = sshll.u32 (!%p1019_p2), %s1036_s23, 3  ;;  %s256_s5 = scalar_lea.sflag (!%p1019_p2), [#allocation3], %s1036_s23 }
  0x29   : > { %s259_s7 = scalar_lea.vmem (!%p1019_p2), [#allocation2], %s1039_s1 }
  0x2b   : > { %872 = dma.done.wait (%p987_p8), %s256_s5, 128  }
  0x2c   : > { %874 = vsyncadd (%p987_p8), %s256_s5, 4294967168  ;;  %s265_s17 = sand.u32 1, %s967_s21   ;;  %s269_s29 = scalar_lea.vmem [#allocation5], %s1039_s1 }
  0x2d   : > { %s266_s19 = scalar_lea.sflag [#allocation6], %s265_s17 }
  0x2e   : > { %876 = dma.done.wait (%p987_p8), %s266_s19, 256  }
  0x2f   : > { %878 = vsyncadd (%p987_p8), %s266_s19, 4294967040  ;;  %vm324_vm0 = vcmask 261120   ;;  %v322_v0 = vld [vmem:[%s269_s29] sm:$0xff]  ;;  %v320_v1 = vld [vmem:[%s259_s7] sm:$0xff]  ;;  %vm351_vm1 = vcmask 64512   ;;  %s279_s21 = scalar_lea.vmem [#allocation7], %s1039_s1 }
  0x30   : > { %611 = vmatpush.xpose.msk.msra.mxu0 %vm324_vm0, %v322_v0  ;;  %v321_v2 = vmul.f32 0.17677669, %v320_v1  ;;  %v323_v10 = vld [vmem:[%s279_s21] sm:$0xff]  ;;  %s616_s27 = sshll.u32 %s901_s18, 3  ;;  %s319_s25 = scalar_lea.vmem [#allocation9], %s1039_s1 }
  0x31   : > { %394 = vmatpush.msra.mxu1 %v323_v10  ;;  %s433_s24 = scalar_lea.hbm %s1118_s4, %s616_s27  ;;  %s435_s26 = sshll.u32 %s319_s25, 4  ;;  %s436_s26 = int_to_ptr.vmem [resolvable:$true] %s435_s26 }
  0x32   : > { %s437_s10 = sshll.u32 %s433_s24, 4  ;;  %s407_s11 = scalar_lea.sflag [#allocation10], %s1036_s23  ;;  %s438_s10 = int_to_ptr.hbm [resolvable:$true] %s437_s10 }
  0x33   : > { %612 = vmatmul.msk.f32.vlgmr.msra.gmra.mxu0 %vm324_vm0, %v321_v2  ;;  %s805_s18 = sshra.s32 %s438_s10, 4  ;;  %s811_s13 = scalar_lea.hbm %s1118_s4, 32  ;;  %s806_s18 = int_to_ptr.hbm [resolvable:$true] %s805_s18 }
  0x34   : > { %s807_s12 = scalar_lea.hbm %s806_s18, 8  ;;  %p812_p6 = scmp.lt.s32.totalorder %s806_s18, %s1118_s4 }
  0x35   : > { %p808_p3 = scmp.ne.s32.totalorder %s806_s18, %s807_s12  ;;  %p813_p7 = scmp.lt.s32.totalorder %s811_s13, %s807_s12 }
  0x37   : > { %p809_p4 = pnand %p808_p3, %p991_p9  ;;  %p814_p8 = por %p813_p7, %p812_p6 }
  0x39   : > { %p810_p5 = pneg %p809_p4 }
  0x3b   : > { %p815_p10 = pnand %p814_p8, %p810_p5 }
  0xb0   : > { %v348_v3 = vpop.f32.mrf.mxu0 }
  0xb1   : > { %v352_v4 = vsel %vm351_vm1, %v348_v3, -inf }
  0xb2   : > { %353 = vmax.xlane.f32.xlu0 %v352_v4 }
 0x125   : > { %v354_v5 = vpop.xlane.xlu0 %353 }
 0x126   : > { %v355_v6 = vsub.f32 %v348_v3, %v354_v5 }
 0x128   : > { %v356_v7 = vmul.f32 1.442695, %v355_v6 }
 0x12a   : > { %697 = vpow2.f32 %v356_v7 }
 0x130   : > { %v698_v8 = vpop.eup %697 }
 0x131   : > { %v358_v9 = vsel %vm351_vm1, %v698_v8, 0.0 }
 0x132   : > { %359 = vadd.xlane.f32.xlu0 %v358_v9 }
 0x1a5   : > { %v360_v11 = vpop.xlane.xlu0 %359 }
 0x1a6   : > { %699 = vrcp.f32 %v360_v11  ;;  %v372_v15 = vand.u32 2147483648, %v360_v11  ;;  %v370_v17 = vand.u32 2147483647, %v360_v11  ;;  %vm366_vm3 = vweird.f32 %v360_v11 }
 0x1a8   : > { %v373_v19 = vor.u32 1.1754944e-38, %v372_v15  ;;  %vm371_vm5 = vcmp.eq.f32.partialorder %v370_v17, 8.507059e+37 }
 0x1ac   : > { %v700_v12 = vpop.eup %699 }
 0x1ad   : > { %v362_v13 = vmul.f32 %v700_v12, %v360_v11  ;;  %vm367_vm2 = vweird.f32 %v700_v12 }
 0x1ae   : > { %vm368_vm4 = vmor %vm366_vm3, %vm367_vm2 }
 0x1af   : > { %v363_v14 = vsub.f32 1.0, %v362_v13 }
 0x1b1   : > { %v364_v16 = vmul.f32 %v700_v12, %v363_v14 }
 0x1b3   : > { %v365_v18 = vadd.f32 %v700_v12, %v364_v16 }
 0x1b5   : > { %v369_v20 = vsel %vm368_vm4, %v700_v12, %v365_v18 }
 0x1b6   : > { %v374_v21 = vsel %vm371_vm5, %v373_v19, %v369_v20 }
 0x1b7   : > { %v375_v22 = vmul.f32 %v698_v8, %v374_v21 }
 0x1b9   : > { %613 = vmatmul.msk.f32.vlgmr.msra.gmra.mxu1 %vm351_vm1, %v375_v22  ;;  %400 = vst.msk [vmem:[%s319_s25] sm:$0xff] %vm351_vm1, %v375_v22 }
 0x1ba   : > { %818 = shalt.err (!%p815_p10)
}
 0x1bb   : > { %627 = dma.vmem_to_hbm [thread:$0]  (%p991_p9), %s436_s26, 128, %s438_s10, %s407_s11  }
 0x1bc   : > { %s418_s19 = scalar_lea.hbm %s1117_s3, %s616_s27  ;;  %s312_s29 = scalar_lea.vmem [#allocation8], %s1039_s1 }
 0x1bd   : > { %s420_s21 = sshll.u32 %s312_s29, 4  ;;  %s422_s6 = sshll.u32 %s418_s19, 4  ;;  %s421_s21 = int_to_ptr.vmem [resolvable:$true] %s420_s21  ;;  %s423_s6 = int_to_ptr.hbm [resolvable:$true] %s422_s6 }
 0x1be   : > { %s402_s8 = scalar_lea.sflag [#allocation4], %s1036_s23  ;;  %s833_s24 = sshra.s32 %s423_s6, 4  ;;  %s834_s24 = int_to_ptr.hbm [resolvable:$true] %s833_s24 }
 0x1bf   : > { %s835_s25 = scalar_lea.hbm %s834_s24, 8  ;;  %s839_s27 = scalar_lea.hbm %s1117_s3, 32 }
 0x1c0   : > { %p836_p12 = scmp.ne.s32.totalorder %s834_s24, %s835_s25  ;;  %p840_p1 = scmp.lt.s32.totalorder %s834_s24, %s1117_s3 }
 0x1c1   : > { %p841_p2 = scmp.lt.s32.totalorder %s839_s27, %s835_s25 }
 0x1c2   : > { %p837_p13 = pnand %p836_p12, %p991_p9 }
 0x1c3   : > { %p842_p3 = por %p841_p2, %p840_p1 }
 0x1c4   : > { %p838_p0 = pneg %p837_p13 }
 0x1c6   : > { %p843_p4 = pnand %p842_p3, %p838_p0 }
 0x236   : > { %v396_v23 = vpop.f32.mrf.mxu1 }
 0x237   : > { %399 = vst.msk [vmem:[%s312_s29] sm:$0xff] %vm324_vm0, %v396_v23 }
 0x238   : > { %846 = shalt.err (!%p843_p4)
}
 0x239   : > { %626 = dma.vmem_to_hbm [thread:$0]  (%p991_p9), %s421_s21, 128, %s423_s6, %s402_s8  }
 0x23a PF: > { %p648_p5 = scmp.ge.s32.totalorder %s909_s20, 2  ;;  %s449_s23 = sand.u32 1, %s889_s15  }
 0x23b   : > { %s450_s18 = scalar_lea.sflag [#allocation4], %s449_s23 }
 0x23c   : > { %p641_p6 = pnand %p648_p5, %p998_p11 }
 0x23e   : > { %p642_p7 = pneg %p641_p6 }
 0x240   : > { %880 = dma.done.wait (%p642_p7), %s450_s18, 128  }
 0x241   : > { %882 = vsyncadd (%p642_p7), %s450_s18, 4294967168  ;;  %s460_s12 = scalar_lea.sflag [#allocation10], %s449_s23 }
 0x242   : > { %884 = dma.done.wait (%p642_p7), %s460_s12, 128  }
 0x243   : > { %886 = vsyncadd (%p642_p7), %s460_s12, 4294967168  ;;  %s27_s20 = sadd.s32 1, %s909_s20   ;;  %s1134_s28 = sld [smem:[#allocation15_spill]] }
 0x244   : > { %p24_p8 = scmp.ge.s32.totalorder %s27_s20, 6   ;;  %s1135_s17 = sld [smem:[#allocation18_spill]] }
 0x245   : > { %s1136_s18 = sld [smem:[#allocation16_spill]]  ;;  %s1138_s15 = smov %s893_s16 }
 0x246   : > { %s1137_s19 = sld [smem:[#allocation17_spill]]  ;;  %26 = sbr.rel (!%p24_p8) target bundleno = 12 (0xc), region = 118 }
 0x249   : > { %s1139_s16 = smov %s1134_s28 }
 0x24b   :  { %466 = vsyncpa [#allocation3], 1 }
 0x24c   :  { %468 = vsyncpa [#allocation3 + $0x1], 1 }
 0x24d   :  { %469 = vsyncpa [#allocation6], 1 }
 0x24e   :  { %471 = vsyncpa [#allocation6 + $0x1], 1 }
 0x24f   :  { %472 = vsyncpa [#allocation4], 1 }
 0x250   :  { %474 = vsyncpa [#allocation4 + $0x1], 1 }
 0x251   :  { %475 = vsyncpa [#allocation10], 1 }
 0x252   :  { %477 = vsyncpa [#allocation10 + $0x1], 1 }

</bundles_post_ra>
